<compile_context>
chip_gen: v6e
topology: v6e:2x2x1
jax: 0.10.0
libtpu: 0.0.40
codegen_flags: <defaults>
</compile_context>

<pallas_src>
import functools

import jax
import jax.numpy as jnp
from jax import lax
from jax.experimental import pallas as pl
from jax.experimental.pallas import tpu as pltpu

H1 = 64   # res_block1 width
H2 = 32   # res_block2 width


def _round_up(n, m):
    return ((n + m - 1) // m) * m


def _cdiv(a, b):
    return -(-a // b)


def _obesity_kernel(
    x_ref,                # (TILE_B, input_dim) bf16
    w1_ref, b1_ref,       # [in, 2*H1] bf16 = fc1 | shortcut of block 1 (fused); bias [1, 2*H1] f32
    w1b_ref, b1b_ref,     # block 1 fc2 augmented: [[w1b],[I64]] -> [2*H1, H1] bf16; bias [1, H1] f32
    w2_ref, b2_ref,       # [H1, 2*H2] bf16 = fc1 | shortcut of block 2 (fused); bias [1, 2*H2] f32
    w2b_ref, b2b_ref,     # block 2 fc2 augmented: [[w2b],[I32]] -> [2*H2, H2] bf16; bias [1, H2] f32
    wf_ref, bf_ref,       # fc_final padded: [H2, out_pad] bf16, [1, out_pad] f32
    o_ref,                # (TILE_B, out_pad) f32
):
    x = x_ref[...]

    # ---- ResidualBlock 1 (input_dim -> 64): fused fc1 | shortcut ----
    y1 = jnp.dot(x, w1_ref[...], preferred_element_type=jnp.float32) + b1_ref[...]
    col1 = lax.broadcasted_iota(jnp.int32, y1.shape, 1)
    # ReLU on the fc1 half only (masked select, no lane slicing); shortcut half passes through.
    z1 = jnp.where(col1 < H1, jnp.maximum(y1, 0.0), y1).astype(w1b_ref.dtype)
    # TODO(synk): nn.Dropout(0.3) is identity in eval mode; training-mode dropout not implemented.
    # Identity-augmented fc2: z1 @ [[w1b],[I]] == relu(fc1(x)) @ w1b + shortcut(x)
    h = jnp.dot(z1, w1b_ref[...], preferred_element_type=jnp.float32) + b1b_ref[...]
    h = jnp.maximum(h, 0.0).astype(w2_ref.dtype)

    # ---- ResidualBlock 2 (64 -> 32): fused fc1 | shortcut ----
    y2 = jnp.dot(h, w2_ref[...], preferred_element_type=jnp.float32) + b2_ref[...]
    col2 = lax.broadcasted_iota(jnp.int32, y2.shape, 1)
    z2 = jnp.where(col2 < H2, jnp.maximum(y2, 0.0), y2).astype(w2b_ref.dtype)
    g = jnp.dot(z2, w2b_ref[...], preferred_element_type=jnp.float32) + b2b_ref[...]
    g = jnp.maximum(g, 0.0).astype(wf_ref.dtype)

    # ---- fc_final (32 -> out_dim, padded to a multiple of 8 lanes) ----
    out = jnp.dot(g, wf_ref[...], preferred_element_type=jnp.float32) + bf_ref[...]
    o_ref[...] = out.astype(o_ref.dtype)


def _pack_params(params, out_dim):
    """Fuse fc1|shortcut weights, append identity blocks to fc2, pad fc_final; cast matmul
    operands to bf16 (biases stay f32 since they're added to f32 accumulators)."""
    bf16 = jnp.bfloat16
    out_pad = max(8, _round_up(out_dim, 8))

    w1 = jnp.concatenate([params["w1a"], params["w1s"]], axis=1).astype(bf16)    # [in, 128]
    b1 = jnp.concatenate([params["b1a"], params["b1s"]], axis=1)                 # [1, 128] f32
    w1b = jnp.concatenate([params["w1b"], jnp.eye(H1, dtype=jnp.float32)],
                          axis=0).astype(bf16)                                   # [128, 64]
    b1b = params["b1b"]                                                          # [1, 64] f32

    w2 = jnp.concatenate([params["w2a"], params["w2s"]], axis=1).astype(bf16)    # [64, 64]
    b2 = jnp.concatenate([params["b2a"], params["b2s"]], axis=1)                 # [1, 64] f32
    w2b = jnp.concatenate([params["w2b"], jnp.eye(H2, dtype=jnp.float32)],
                          axis=0).astype(bf16)                                   # [64, 32]
    b2b = params["b2b"]                                                          # [1, 32] f32

    wf = jnp.zeros((H2, out_pad), jnp.float32).at[:, :out_dim].set(params["wf"]).astype(bf16)
    bf = jnp.zeros((1, out_pad), jnp.float32).at[:, :out_dim].set(params["bf"])

    return (w1, b1, w1b, b1b, w2, b2, w2b, b2b, wf, bf)


@functools.partial(jax.jit, static_argnames=("out_dim", "tile_b"))
def _forward_impl(x, packed, *, out_dim, tile_b):
    B, input_dim = x.shape
    out_pad = packed[-1].shape[1]

    # Balanced batch tiling: bound pad waste, keep the sublane dim a multiple of 8,
    # and give v7x's two TensorCores at least 2 grid steps when the batch allows it.
    n_tiles = max(1, _cdiv(B, tile_b))
    if n_tiles < 2 and B > 8:
        n_tiles = 2
    eff_tile = max(8, _round_up(_cdiv(B, n_tiles), 8))
    B_pad = n_tiles * eff_tile

    x = x.astype(jnp.bfloat16)
    if B_pad != B:
        x = jnp.pad(x, ((0, B_pad - B), (0, 0)))

    # x / output are batch-tiled; weights/biases are full blocks, VMEM-resident.
    x_spec = pl.BlockSpec((eff_tile, input_dim), lambda i: (i, 0))
    weight_specs = [pl.BlockSpec(a.shape, lambda i: (0, 0)) for a in packed]
    out_spec = pl.BlockSpec((eff_tile, out_pad), lambda i: (i, 0))

    out_full = pl.pallas_call(
        _obesity_kernel,
        out_shape=jax.ShapeDtypeStruct((B_pad, out_pad), jnp.float32),
        grid=(n_tiles,),
        in_specs=[x_spec] + weight_specs,
        out_specs=out_spec,
        compiler_params=pltpu.CompilerParams(
            dimension_semantics=("parallel",),
        ),
    )(x, *packed)

    # Slice inside jit so XLA fuses it with the kernel output (no extra HBM pass).
    return out_full[:B, :out_dim]


def obesity_classifier_forward(x, params, *, tile_b=2048):
    """x: [B, input_dim] float32. params: dict of weights (already transposed to [in, out])."""
    out_dim = params["wf"].shape[1]
    packed = _pack_params(params, out_dim)
    return _forward_impl(x, packed, out_dim=out_dim, tile_b=tile_b)


def init_params(key, input_dim, output_dim):
    """Deterministic init mimicking nn.Linear shapes. Weights stored as [in, out]."""
    def linear(key, fan_in, fan_out):
        kw, kb = jax.random.split(key)
        bound = 1.0 / jnp.sqrt(fan_in)
        w = jax.random.uniform(kw, (fan_in, fan_out), jnp.float32, -bound, bound)
        b = jax.random.uniform(kb, (1, fan_out), jnp.float32, -bound, bound)
        return w, b

    keys = jax.random.split(key, 7)
    params = {}
    # res_block1: fc1 (input_dim->64), fc2 (64->64), shortcut (input_dim->64)
    params["w1a"], params["b1a"] = linear(keys[0], input_dim, H1)
    params["w1b"], params["b1b"] = linear(keys[1], H1, H1)
    params["w1s"], params["b1s"] = linear(keys[2], input_dim, H1)
    # res_block2: fc1 (64->32), fc2 (32->32), shortcut (64->32)
    params["w2a"], params["b2a"] = linear(keys[3], H1, H2)
    params["w2b"], params["b2b"] = linear(keys[4], H2, H2)
    params["w2s"], params["b2s"] = linear(keys[5], H1, H2)
    # fc_final: (32 -> output_dim)
    params["wf"], params["bf"] = linear(keys[6], H2, output_dim)
    return params


def reference_forward(x, p):
    """Plain JAX (f32) reference of the PyTorch forward (eval mode)."""
    r = x @ p["w1s"] + p["b1s"]
    h = jnp.maximum(x @ p["w1a"] + p["b1a"], 0.0)
    h = h @ p["w1b"] + p["b1b"]
    h = jnp.maximum(h + r, 0.0)
    r = h @ p["w2s"] + p["b2s"]
    g = jnp.maximum(h @ p["w2a"] + p["b2a"], 0.0)
    g = g @ p["w2b"] + p["b2b"]
    g = jnp.maximum(g + r, 0.0)
    return g @ p["wf"] + p["bf"]


if __name__ == "__main__":
    key = jax.random.PRNGKey(0)
    k_x, k_p = jax.random.split(key)

    batch = 2
    input_dim = 16
    output_dim = 7

    x = jax.random.normal(k_x, (batch, input_dim), jnp.float32)
    params = init_params(k_p, input_dim, output_dim)

    out = jax.block_until_ready(obesity_classifier_forward(x, params))
    ref = reference_forward(x, params)
    assert out.shape == (batch, output_dim)
    # bf16 matmul operands (f32 accumulation) -> loosen tolerance vs the f32 reference.
    assert jnp.allclose(out, ref, atol=5e-2, rtol=5e-2), "mismatch vs JAX reference"

    # Also exercise a batch that is not a multiple of the tile (padding + multi-tile path).
    x_big = jax.random.normal(k_x, (1000, input_dim), jnp.float32)
    out_big = jax.block_until_ready(obesity_classifier_forward(x_big, params))
    ref_big = reference_forward(x_big, params)
    assert out_big.shape == (1000, output_dim)
    assert jnp.allclose(out_big, ref_big, atol=5e-2, rtol=5e-2), "mismatch (big batch)"

    print("KERNEL_OK")
</pallas_src>

<mosaic_0001>
module attributes {stable_mosaic.version = 11 : i64} {
  func.func @_obesity_kernel(%arg0: i32, %arg1: memref<8x16xbf16, #tpu.memory_space<vmem>>, %arg2: memref<16x128xbf16, #tpu.memory_space<vmem>>, %arg3: memref<1x128xf32, #tpu.memory_space<vmem>>, %arg4: memref<128x64xbf16, #tpu.memory_space<vmem>>, %arg5: memref<1x64xf32, #tpu.memory_space<vmem>>, %arg6: memref<64x64xbf16, #tpu.memory_space<vmem>>, %arg7: memref<1x64xf32, #tpu.memory_space<vmem>>, %arg8: memref<64x32xbf16, #tpu.memory_space<vmem>>, %arg9: memref<1x32xf32, #tpu.memory_space<vmem>>, %arg10: memref<32x8xbf16, #tpu.memory_space<vmem>>, %arg11: memref<1x8xf32, #tpu.memory_space<vmem>>, %arg12: memref<8x8xf32, #tpu.memory_space<vmem>>) attributes {dimension_semantics = [#tpu.dimension_semantics<parallel>], iteration_bounds = array<i64: 1>, scalar_prefetch = 0 : i64, scratch_operands = 0 : i64, tpu.core_type = #tpu.core_type<tc>, window_params = [{transform_indices = @transform_0, window_bounds = array<i64: 8, 16>}, {pipeline_mode = #tpu.pipeline_mode<synchronous>, transform_indices = @transform_1, window_bounds = array<i64: 16, 128>}, {pipeline_mode = #tpu.pipeline_mode<synchronous>, transform_indices = @transform_2, window_bounds = array<i64: 1, 128>}, {pipeline_mode = #tpu.pipeline_mode<synchronous>, transform_indices = @transform_3, window_bounds = array<i64: 128, 64>}, {pipeline_mode = #tpu.pipeline_mode<synchronous>, transform_indices = @transform_4, window_bounds = array<i64: 1, 64>}, {pipeline_mode = #tpu.pipeline_mode<synchronous>, transform_indices = @transform_5, window_bounds = array<i64: 64, 64>}, {pipeline_mode = #tpu.pipeline_mode<synchronous>, transform_indices = @transform_6, window_bounds = array<i64: 1, 64>}, {pipeline_mode = #tpu.pipeline_mode<synchronous>, transform_indices = @transform_7, window_bounds = array<i64: 64, 32>}, {pipeline_mode = #tpu.pipeline_mode<synchronous>, transform_indices = @transform_8, window_bounds = array<i64: 1, 32>}, {pipeline_mode = #tpu.pipeline_mode<synchronous>, transform_indices = @transform_9, window_bounds = array<i64: 32, 8>}, {pipeline_mode = #tpu.pipeline_mode<synchronous>, transform_indices = @transform_10, window_bounds = array<i64: 1, 8>}, {transform_indices = @transform_11, window_bounds = array<i64: 8, 8>}]} {
    %c0 = arith.constant 0 : index
    %c0_0 = arith.constant 0 : index
    %0 = vector.load %arg1[%c0, %c0_0] : memref<8x16xbf16, #tpu.memory_space<vmem>>, vector<8x16xbf16>
    %c0_1 = arith.constant 0 : index
    %c0_2 = arith.constant 0 : index
    %1 = vector.load %arg2[%c0_1, %c0_2] : memref<16x128xbf16, #tpu.memory_space<vmem>>, vector<16x128xbf16>
    %cst = arith.constant dense<0.000000e+00> : vector<8x128xf32>
    %2 = tpu.matmul %0, %1, %cst {dimension_numbers = #tpu.dot_dimension_numbers<[1], [0], [0], [1], [0, 0, 1, 1], [], []>} : vector<8x16xbf16>, vector<16x128xbf16>, vector<8x128xf32> -> vector<8x128xf32>
    %c0_3 = arith.constant 0 : index
    %c0_4 = arith.constant 0 : index
    %3 = vector.load %arg3[%c0_3, %c0_4] : memref<1x128xf32, #tpu.memory_space<vmem>>, vector<1x128xf32>
    %4 = vector.broadcast %3 : vector<1x128xf32> to vector<8x128xf32>
    %5 = arith.addf %2, %4 : vector<8x128xf32>
    %6 = tpu.iota {dimensions = array<i32: 1>} : vector<8x128xi32>
    %c64_i32 = arith.constant 64 : i32
    %7 = vector.broadcast %c64_i32 : i32 to vector<8x128xi32>
    %8 = arith.cmpi slt, %6, %7 : vector<8x128xi32>
    %cst_5 = arith.constant 0.000000e+00 : f32
    %9 = vector.broadcast %cst_5 : f32 to vector<8x128xf32>
    %10 = arith.maximumf %5, %9 : vector<8x128xf32>
    %11 = arith.select %8, %10, %5 : vector<8x128xi1>, vector<8x128xf32>
    %12 = arith.truncf %11 : vector<8x128xf32> to vector<8x128xbf16>
    %c0_6 = arith.constant 0 : index
    %c0_7 = arith.constant 0 : index
    %13 = vector.load %arg4[%c0_6, %c0_7] : memref<128x64xbf16, #tpu.memory_space<vmem>>, vector<128x64xbf16>
    %cst_8 = arith.constant dense<0.000000e+00> : vector<8x64xf32>
    %14 = tpu.matmul %12, %13, %cst_8 {dimension_numbers = #tpu.dot_dimension_numbers<[1], [0], [0], [1], [0, 0, 1, 1], [], []>} : vector<8x128xbf16>, vector<128x64xbf16>, vector<8x64xf32> -> vector<8x64xf32>
    %c0_9 = arith.constant 0 : index
    %c0_10 = arith.constant 0 : index
    %15 = vector.load %arg5[%c0_9, %c0_10] : memref<1x64xf32, #tpu.memory_space<vmem>>, vector<1x64xf32>
    %16 = vector.broadcast %15 : vector<1x64xf32> to vector<8x64xf32>
    %17 = arith.addf %14, %16 : vector<8x64xf32>
    %cst_11 = arith.constant 0.000000e+00 : f32
    %18 = vector.broadcast %cst_11 : f32 to vector<8x64xf32>
    %19 = arith.maximumf %17, %18 : vector<8x64xf32>
    %20 = arith.truncf %19 : vector<8x64xf32> to vector<8x64xbf16>
    %c0_12 = arith.constant 0 : index
    %c0_13 = arith.constant 0 : index
    %21 = vector.load %arg6[%c0_12, %c0_13] : memref<64x64xbf16, #tpu.memory_space<vmem>>, vector<64x64xbf16>
    %cst_14 = arith.constant dense<0.000000e+00> : vector<8x64xf32>
    %22 = tpu.matmul %20, %21, %cst_14 {dimension_numbers = #tpu.dot_dimension_numbers<[1], [0], [0], [1], [0, 0, 1, 1], [], []>} : vector<8x64xbf16>, vector<64x64xbf16>, vector<8x64xf32> -> vector<8x64xf32>
    %c0_15 = arith.constant 0 : index
    %c0_16 = arith.constant 0 : index
    %23 = vector.load %arg7[%c0_15, %c0_16] : memref<1x64xf32, #tpu.memory_space<vmem>>, vector<1x64xf32>
    %24 = vector.broadcast %23 : vector<1x64xf32> to vector<8x64xf32>
    %25 = arith.addf %22, %24 : vector<8x64xf32>
    %26 = tpu.iota {dimensions = array<i32: 1>} : vector<8x64xi32>
    %c32_i32 = arith.constant 32 : i32
    %27 = vector.broadcast %c32_i32 : i32 to vector<8x64xi32>
    %28 = arith.cmpi slt, %26, %27 : vector<8x64xi32>
    %cst_17 = arith.constant 0.000000e+00 : f32
    %29 = vector.broadcast %cst_17 : f32 to vector<8x64xf32>
    %30 = arith.maximumf %25, %29 : vector<8x64xf32>
    %31 = arith.select %28, %30, %25 : vector<8x64xi1>, vector<8x64xf32>
    %32 = arith.truncf %31 : vector<8x64xf32> to vector<8x64xbf16>
    %c0_18 = arith.constant 0 : index
    %c0_19 = arith.constant 0 : index
    %33 = vector.load %arg8[%c0_18, %c0_19] : memref<64x32xbf16, #tpu.memory_space<vmem>>, vector<64x32xbf16>
    %cst_20 = arith.constant dense<0.000000e+00> : vector<8x32xf32>
    %34 = tpu.matmul %32, %33, %cst_20 {dimension_numbers = #tpu.dot_dimension_numbers<[1], [0], [0], [1], [0, 0, 1, 1], [], []>} : vector<8x64xbf16>, vector<64x32xbf16>, vector<8x32xf32> -> vector<8x32xf32>
    %c0_21 = arith.constant 0 : index
    %c0_22 = arith.constant 0 : index
    %35 = vector.load %arg9[%c0_21, %c0_22] : memref<1x32xf32, #tpu.memory_space<vmem>>, vector<1x32xf32>
    %36 = vector.broadcast %35 : vector<1x32xf32> to vector<8x32xf32>
    %37 = arith.addf %34, %36 : vector<8x32xf32>
    %cst_23 = arith.constant 0.000000e+00 : f32
    %38 = vector.broadcast %cst_23 : f32 to vector<8x32xf32>
    %39 = arith.maximumf %37, %38 : vector<8x32xf32>
    %40 = arith.truncf %39 : vector<8x32xf32> to vector<8x32xbf16>
    %c0_24 = arith.constant 0 : index
    %c0_25 = arith.constant 0 : index
    %41 = vector.load %arg10[%c0_24, %c0_25] : memref<32x8xbf16, #tpu.memory_space<vmem>>, vector<32x8xbf16>
    %cst_26 = arith.constant dense<0.000000e+00> : vector<8x8xf32>
    %42 = tpu.matmul %40, %41, %cst_26 {dimension_numbers = #tpu.dot_dimension_numbers<[1], [0], [0], [1], [0, 0, 1, 1], [], []>} : vector<8x32xbf16>, vector<32x8xbf16>, vector<8x8xf32> -> vector<8x8xf32>
    %c0_27 = arith.constant 0 : index
    %c0_28 = arith.constant 0 : index
    %43 = vector.load %arg11[%c0_27, %c0_28] : memref<1x8xf32, #tpu.memory_space<vmem>>, vector<1x8xf32>
    %44 = vector.broadcast %43 : vector<1x8xf32> to vector<8x8xf32>
    %45 = arith.addf %42, %44 : vector<8x8xf32>
    %c0_29 = arith.constant 0 : index
    %c0_30 = arith.constant 0 : index
    %46 = vector.load %arg12[%c0_29, %c0_30] : memref<8x8xf32, #tpu.memory_space<vmem>>, vector<8x8xf32>
    tpu.vector_store %arg12[%c0_29, %c0_30], %45 {strides = array<i32>} : memref<8x8xf32, #tpu.memory_space<vmem>>, vector<8x8xf32>,
    return
  }
  func.func @transform_0(%arg0: i32) -> (i32, i32) {
    %c0_i32 = arith.constant 0 : i32
    %c0_i32_0 = arith.constant 0 : i32
    return %arg0, %c0_i32 : i32, i32
  }
  func.func @transform_1(%arg0: i32) -> (i32, i32) {
    %c0_i32 = arith.constant 0 : i32
    %c0_i32_0 = arith.constant 0 : i32
    %c0_i32_1 = arith.constant 0 : i32
    return %c0_i32, %c0_i32_0 : i32, i32
  }
  func.func @transform_2(%arg0: i32) -> (i32, i32) {
    %c0_i32 = arith.constant 0 : i32
    %c0_i32_0 = arith.constant 0 : i32
    %c0_i32_1 = arith.constant 0 : i32
    return %c0_i32, %c0_i32_0 : i32, i32
  }
  func.func @transform_3(%arg0: i32) -> (i32, i32) {
    %c0_i32 = arith.constant 0 : i32
    %c0_i32_0 = arith.constant 0 : i32
    %c0_i32_1 = arith.constant 0 : i32
    return %c0_i32, %c0_i32_0 : i32, i32
  }
  func.func @transform_4(%arg0: i32) -> (i32, i32) {
    %c0_i32 = arith.constant 0 : i32
    %c0_i32_0 = arith.constant 0 : i32
    %c0_i32_1 = arith.constant 0 : i32
    return %c0_i32, %c0_i32_0 : i32, i32
  }
  func.func @transform_5(%arg0: i32) -> (i32, i32) {
    %c0_i32 = arith.constant 0 : i32
    %c0_i32_0 = arith.constant 0 : i32
    %c0_i32_1 = arith.constant 0 : i32
    return %c0_i32, %c0_i32_0 : i32, i32
  }
  func.func @transform_6(%arg0: i32) -> (i32, i32) {
    %c0_i32 = arith.constant 0 : i32
    %c0_i32_0 = arith.constant 0 : i32
    %c0_i32_1 = arith.constant 0 : i32
    return %c0_i32, %c0_i32_0 : i32, i32
  }
  func.func @transform_7(%arg0: i32) -> (i32, i32) {
    %c0_i32 = arith.constant 0 : i32
    %c0_i32_0 = arith.constant 0 : i32
    %c0_i32_1 = arith.constant 0 : i32
    return %c0_i32, %c0_i32_0 : i32, i32
  }
  func.func @transform_8(%arg0: i32) -> (i32, i32) {
    %c0_i32 = arith.constant 0 : i32
    %c0_i32_0 = arith.constant 0 : i32
    %c0_i32_1 = arith.constant 0 : i32
    return %c0_i32, %c0_i32_0 : i32, i32
  }
  func.func @transform_9(%arg0: i32) -> (i32, i32) {
    %c0_i32 = arith.constant 0 : i32
    %c0_i32_0 = arith.constant 0 : i32
    %c0_i32_1 = arith.constant 0 : i32
    return %c0_i32, %c0_i32_0 : i32, i32
  }
  func.func @transform_10(%arg0: i32) -> (i32, i32) {
    %c0_i32 = arith.constant 0 : i32
    %c0_i32_0 = arith.constant 0 : i32
    %c0_i32_1 = arith.constant 0 : i32
    return %c0_i32, %c0_i32_0 : i32, i32
  }
  func.func @transform_11(%arg0: i32) -> (i32, i32) {
    %c0_i32 = arith.constant 0 : i32
    %c0_i32_0 = arith.constant 0 : i32
    return %arg0, %c0_i32 : i32, i32
  }
}

</mosaic_0001>

<bundles_post_ra>
// kernel: _forward_impl.1
= control target key start
LH: loop header
LB: loop body
LE: loop exit
PB: predicated region body
PF: predicated region fallthrough
CT: control target
= control target key end

     0   :  { %v593_v0 = vmov 0.0   ;;  %vm594_vm0 = vmmov 0   ;;  %vm55_vm1 = vcmask 130048   ;;  %v99_v13 = vlaneseq  ;;  %s764_s1 = inlined_call_operand.vmem [shape: bf16[16,128], index: 1, kind: input, shape index: {}]   ;;  %s765_s0 = inlined_call_operand.vmem [shape: bf16[8,16], index: 0, kind: input, shape index: {}]   ;;  %s766_s3 = inlined_call_operand.vmem [shape: bf16[128,64], index: 3, kind: input, shape index: {}]   ;;  %s767_s5 = inlined_call_operand.vmem [shape: bf16[64,64], index: 5, kind: input, shape index: {}]   ;;  %s768_s2 = inlined_call_operand.vmem [shape: f32[1,128], index: 2, kind: input, shape index: {}]   ;;  %s769_s7 = inlined_call_operand.vmem [shape: bf16[64,32], index: 7, kind: input, shape index: {}]   ;;  %s770_s4 = inlined_call_operand.vmem [shape: f32[1,64], index: 4, kind: input, shape index: {}]   ;;  %s771_s9 = inlined_call_operand.vmem [shape: bf16[32,8], index: 9, kind: input, shape index: {}]   ;;  %s772_s6 = inlined_call_operand.vmem [shape: f32[1,64], index: 6, kind: input, shape index: {}]   ;;  %s773_s8 = inlined_call_operand.vmem [shape: f32[1,32], index: 8, kind: input, shape index: {}]   ;;  %s774_s10 = inlined_call_operand.vmem [shape: f32[1,8], index: 10, kind: input, shape index: {}]   ;;  %s775_s11 = inlined_call_operand.vmem [shape: f32[8,8], index: 11, kind: output, shape index: {}]  }
   0x1   :  { %514 = vmatprep.subr.bf16.mxu0 %v593_v0  ;;  %v574_v1 = vld [vmem:[%s764_s1] sm:$0xff]   ;;  %516 = vmatprep.mubr.msk.bf16.mxu0 %vm594_vm0, %v593_v0  ;;  %v575_v3 = vld [vmem:[%s766_s3 + $0x38] sm:$0xff]   ;;  %v576_v4 = vld [vmem:[%s766_s3 + $0x30] sm:$0xff]   ;;  %vm257_vm3 = vcmask 523264   ;;  %vm412_vm5 = vcmask 261120   ;;  %vm456_vm6 = vcmask 64512  }
   0x2   :  { %v39_v2 = vld [vmem:[%s765_s0] sm:$0xf]  ;;  %520 = vmatprep.subr.bf16.mxu1 %v593_v0  ;;  %536 = vmatprep.mubr.msk.bf16.mxu1 %vm594_vm0, %v593_v0  ;;  %v577_v5 = vld [vmem:[%s766_s3 + $0x28] sm:$0xff]   ;;  %v579_v7 = vld [vmem:[%s766_s3 + $0x18] sm:$0xff]   ;;  %v100_v15 = vand.u32 127, %v99_v13 }
   0x3   :  { %515 = vmatpush3.bf16.msra.mxu0 %v574_v1  ;;  %521 = vmatpush3.bf16.msra.mxu1 %v575_v3  ;;  %v578_v6 = vld [vmem:[%s766_s3 + $0x20] sm:$0xff]   ;;  %v580_v8 = vld [vmem:[%s766_s3 + $0x10] sm:$0xff]   ;;  %v581_v9 = vld [vmem:[%s766_s3 + $0x8] sm:$0xff]  }
   0x4   :  { %540 = vmatprep.subr.bf16.mxu0 %v593_v0  ;;  %522 = vmatprep.subr.bf16.mxu1 %v593_v0  ;;  %v582_v10 = vld [vmem:[%s766_s3] sm:$0xff]   ;;  %v583_v11 = vld [vmem:[%s767_s5 + $0x18] sm:$0xff]   ;;  %v584_v12 = vld [vmem:[%s767_s5 + $0x10] sm:$0xff]   ;;  %vm101_vm2 = vcmp.lt.s32.totalorder %v100_v15, 64  ;;  %vm301_vm4 = vcmp.lt.s32.totalorder %v100_v15, 32 }
   0x5   :  { %v462_v14 = vld [vmem:[%s768_s2] ss:$0 sm:$0xff]  ;;  %v585_v24 = vld [vmem:[%s767_s5 + $0x8] sm:$0xff]   ;;  %v587_v32 = vld [vmem:[%s769_s7 + $0x18] sm:$0xff]  }
   0x6   :  { %517 = vmatmul.mubr.msk.bf16.vlgmr.msra.gmra.mxu0 %vm55_vm1, %v39_v2  ;;  %v586_v25 = vld [vmem:[%s767_s5] sm:$0xff]   ;;  %v588_v35 = vld [vmem:[%s769_s7 + $0x10] sm:$0xff]   ;;  %v589_v36 = vld [vmem:[%s769_s7 + $0x8] sm:$0xff]  }
   0x7   :  { %548 = vmatprep.mubr.msk.bf16.mxu0 %vm594_vm0, %v593_v0  ;;  %523 = vmatpush3.bf16.msra.mxu1 %v576_v4  ;;  %v465_v26 = vld [vmem:[%s770_s4] ss:$0 sm:$0xff]  ;;  %v591_v38 = vld [vmem:[%s771_s9 + $0x8] sm:$0xff]  }
   0x8   :  { %524 = vmatprep.subr.bf16.mxu1 %v593_v0  ;;  %541 = vmatpush3.bf16.msra.mxu0 %v583_v11  ;;  %v590_v37 = vld [vmem:[%s769_s7] sm:$0xff]  }
   0x9   :  { %542 = vmatprep.subr.bf16.mxu0 %v593_v0  ;;  %v474_v39 = vld [vmem:[%s772_s6] ss:$0 sm:$0xff] }
   0xa   :  { %v592_v48 = vld [vmem:[%s771_s9] sm:$0xff]  }
   0xb   :  { %525 = vmatpush3.bf16.msra.mxu1 %v577_v5  ;;  %v480_v49 = vld [vmem:[%s773_s8] ss:$0 sm:$0xff] }
   0xc   :  { %526 = vmatprep.subr.bf16.mxu1 %v593_v0  ;;  %543 = vmatpush3.bf16.msra.mxu0 %v584_v12  ;;  %v486_v57 = vld [vmem:[%s774_s10] ss:$0 sm:$0xff] }
   0xd   :  { %544 = vmatprep.subr.bf16.mxu0 %v593_v0 }
   0xf   :  { %527 = vmatpush3.bf16.msra.mxu1 %v578_v6 }
  0x10   :  { %528 = vmatprep.subr.bf16.mxu1 %v593_v0  ;;  %545 = vmatpush3.bf16.msra.mxu0 %v585_v24 }
  0x11   :  { %546 = vmatprep.subr.bf16.mxu0 %v593_v0 }
  0x13   :  { %529 = vmatpush3.bf16.msra.mxu1 %v579_v7 }
  0x14   :  { %530 = vmatprep.subr.bf16.mxu1 %v593_v0  ;;  %547 = vmatpush3.bf16.msra.mxu0 %v586_v25 }
  0x15   :  { %552 = vmatprep.subr.bf16.mxu0 %v593_v0 }
  0x17   :  { %531 = vmatpush3.bf16.msra.mxu1 %v580_v8 }
  0x18   :  { %532 = vmatprep.subr.bf16.mxu1 %v593_v0 }
  0x1b   :  { %533 = vmatpush3.bf16.msra.mxu1 %v581_v9 }
  0x1c   :  { %534 = vmatprep.subr.bf16.mxu1 %v593_v0 }
  0x1f   :  { %535 = vmatpush3.bf16.msra.mxu1 %v582_v10 }
  0x20   :  { %564 = vmatprep.subr.bf16.mxu1 %v593_v0 }
  0xc6   :  { %v93_v16 = vpop.f32.mrf.mxu0 }
  0xc7   :  { %v94_v17 = vadd.f32 %v462_v14, %v93_v16 }
  0xc8   :  { %v518_v18 = vpop.f32.mrf.mxu0 }
  0xc9   :  { %v102_v19 = vmax.f32 %v94_v17, 0.0 }
  0xca   :  { %v96_v20 = vpop.f32.mrf.mxu0 }
  0xcb   :  { %v103_v21 = vsel %vm101_vm2, %v102_v19, %v94_v17 }
  0xcc   :  { %v519_v22 = vpop.f32.mrf.mxu0  ;;  %v104_v23 = vpack.c.bf16 %v103_v21, %v103_v21 }
  0xce   :  { %537 = vmatmul.mubr.bf16.vlgmr.msra.gmra.mxu1 %v104_v23 }
  0xcf   :  { %568 = vmatprep.mubr.msk.bf16.mxu1 %vm594_vm0, %v593_v0  ;;  %565 = vmatpush3.bf16.msra.mxu1 %v591_v38 }
  0xd0   :  { %566 = vmatprep.subr.bf16.mxu1 %v593_v0 }
  0xd3   :  { %567 = vmatpush3.bf16.msra.mxu1 %v592_v48 }
 0x18e   :  { %v210_v27 = vpop.f32.mrf.mxu1 }
 0x18f   :  { %v211_v28 = vadd.f32 %v465_v26, %v210_v27 }
 0x190   :  { %v538_v29 = vpop.f32.mrf.mxu1 }
 0x191   :  { %v216_v30 = vmax.f32 %v211_v28, 0.0 }
 0x192   :  { %v213_v31 = vpop.f32.mrf.mxu1 }
 0x193   :  { %v217_v33 = vpack.c.bf16 %v216_v30, %v216_v30 }
 0x194   :  { %v539_v34 = vpop.f32.mrf.mxu1 }
 0x195   :  { %549 = vmatmul.mubr.msk.bf16.vlgmr.msra.gmra.mxu0 %vm257_vm3, %v217_v33 }
 0x196   :  { %553 = vmatpush3.bf16.msra.mxu0 %v587_v32  ;;  %560 = vmatprep.mubr.msk.bf16.mxu0 %vm594_vm0, %v593_v0 }
 0x197   :  { %554 = vmatprep.subr.bf16.mxu0 %v593_v0 }
 0x19a   :  { %555 = vmatpush3.bf16.msra.mxu0 %v588_v35 }
 0x19b   :  { %556 = vmatprep.subr.bf16.mxu0 %v593_v0 }
 0x19e   :  { %557 = vmatpush3.bf16.msra.mxu0 %v589_v36 }
 0x19f   :  { %558 = vmatprep.subr.bf16.mxu0 %v593_v0 }
 0x1a2   :  { %559 = vmatpush3.bf16.msra.mxu0 %v590_v37 }
 0x255   :  { %v295_v40 = vpop.f32.mrf.mxu0 }
 0x256   :  { %v296_v41 = vadd.f32 %v474_v39, %v295_v40 }
 0x257   :  { %v550_v42 = vpop.f32.mrf.mxu0 }
 0x258   :  { %v302_v43 = vmax.f32 %v296_v41, 0.0 }
 0x259   :  { %v298_v44 = vpop.f32.mrf.mxu0 }
 0x25a   :  { %v303_v45 = vsel %vm301_vm4, %v302_v43, %v296_v41 }
 0x25b   :  { %v304_v46 = vpack.c.bf16 %v303_v45, %v303_v45  ;;  %v551_v47 = vpop.f32.mrf.mxu0 }
 0x25d   :  { %561 = vmatmul.mubr.msk.bf16.vlgmr.msra.gmra.mxu0 %vm257_vm3, %v304_v46 }
 0x31d   :  { %v381_v50 = vpop.f32.mrf.mxu0 }
 0x31e   :  { %v382_v51 = vadd.f32 %v480_v49, %v381_v50 }
 0x31f   :  { %v562_v52 = vpop.f32.mrf.mxu0 }
 0x320   :  { %v387_v53 = vmax.f32 %v382_v51, 0.0 }
 0x321   :  { %v384_v54 = vpop.f32.mrf.mxu0 }
 0x322   :  { %v388_v55 = vpack.c.bf16 %v387_v53, %v387_v53 }
 0x323   :  { %v563_v56 = vpop.f32.mrf.mxu0 }
 0x324   :  { %569 = vmatmul.mubr.msk.bf16.vlgmr.msra.gmra.mxu1 %vm412_vm5, %v388_v55 }
 0x3e4   :  { %v450_v58 = vpop.f32.mrf.mxu1 }
 0x3e5   :  { %v451_v59 = vadd.f32 %v486_v57, %v450_v58 }
 0x3e6   :  { %v570_v60 = vpop.f32.mrf.mxu1 }
 0x3e7   :  { %457 = vst.msk [vmem:[%s775_s11] sm:$0xff] %vm456_vm6, %v451_v59 }
 0x3e8   :  { %v453_v61 = vpop.f32.mrf.mxu1 }
 0x3ea   :  { %v571_v62 = vpop.f32.mrf.mxu1 }

</bundles_post_ra>
